<compile_context>
chip_gen: v7x
topology: tpu7x:2x2x1
jax: 0.10.0
libtpu: 0.0.40
codegen_flags: <defaults>
</compile_context>

<pallas_src>
import functools

import jax
import jax.numpy as jnp
from jax import lax
from jax.experimental import pallas as pl
from jax.experimental.pallas import tpu as pltpu


LANE = 128      # TPU lane width.
SUBLANE = 8     # TPU sublane rows per f32 vreg.


def _round_up(x, m):
    return ((x + m - 1) // m) * m


def _conv3x3_kernel(rc_ref, x_ref, w_ref, b_ref, o_ref, lhs_ref, *,
                    H, W, HW_pad, cin_rows, nb):
    """One grid step: batch tile `n` (nb images) x Cout tile `c`.

    rc_ref : (2, HW_pad) int32            row ids / col ids of flattened pixels
    x_ref  : (nb, cin_rows, HW_pad)       NCHW-flat input tile (compute dtype)
    w_ref  : (c_rows, 9*cin_rows)         im2col weights for this Cout tile
    b_ref  : (c_rows, 1) float32          bias for this Cout tile
    o_ref  : (nb, c_rows, HW_pad)         NCHW-flat output tile
    lhs_ref: (nb, 9*cin_rows, HW_pad)     im2col scratch (persists across c)
    """
    # ---- Build the im2col matrix once per batch tile (hoisted off the c axis).
    @pl.when(pl.program_id(1) == 0)
    def _build_lhs():
        rc = rc_ref[...]
        row = rc[0:1, :]                       # (1, HW_pad)
        col = rc[1:2, :]                       # (1, HW_pad)
        h_ok = {-1: row >= 1, 0: None, 1: row <= H - 2}
        w_ok = {-1: col >= 1, 0: None, 1: col <= W - 2}

        for b in range(nb):
            x = x_ref[b].astype(jnp.float32)   # (cin_rows, HW_pad)
            for ky, dy in enumerate((-1, 0, 1)):
                for kx, dx in enumerate((-1, 0, 1)):
                    off = dy * W + dx          # flat-index shift of this tap
                    patch = x if off == 0 else pltpu.roll(
                        x, shift=(-off) % HW_pad, axis=1)
                    mask = h_ok[dy]
                    if w_ok[dx] is not None:
                        mask = (w_ok[dx] if mask is None
                                else jnp.logical_and(mask, w_ok[dx]))
                    if mask is not None:       # zero the wrapped halo reads
                        patch = jnp.where(
                            jnp.broadcast_to(mask, patch.shape), patch, 0.0)
                    t = ky * 3 + kx
                    lhs_ref[b, t * cin_rows:(t + 1) * cin_rows, :] = (
                        patch.astype(lhs_ref.dtype))

    # ---- Pure MXU work per c step: (c_rows, 9*Cin) x (9*Cin, H*W), f32 acc.
    for b in range(nb):
        acc = lax.dot_general(
            w_ref[...], lhs_ref[b],
            dimension_numbers=(((1,), (0,)), ((), ())),
            preferred_element_type=jnp.float32)        # (c_rows, HW_pad)
        acc = acc + b_ref[...]                         # lane-broadcast bias
        o_ref[b] = acc.astype(o_ref.dtype)


def normal_conv2d(x_nchw, weight_oihw, bias, *, compute_dtype=jnp.bfloat16, nb=1):
    """3x3, stride 1, padding 1 conv == nn.Conv2d(Cin, Cout, 3, padding=1)."""
    N, Cin, H, W = x_nchw.shape
    Cout = weight_oihw.shape[0]
    assert N % nb == 0, "batch must be divisible by the batch tile nb"

    HW = H * W
    HW_pad = _round_up(HW, LANE)              # lane-aligned flattened image
    Cin_pad = _round_up(Cin, SUBLANE)         # sublane-aligned channel rows
    if Cout <= LANE:
        Cout_pad = _round_up(Cout, SUBLANE)   # pad to sublane granularity only
        c_rows = Cout_pad                     #   -> no 128-row write blow-up
    else:
        Cout_pad = _round_up(Cout, LANE)
        c_rows = LANE
    n_ct = Cout_pad // c_rows

    # NCHW-flat input (free reshape), channel/lane pad, cast to compute dtype.
    x_flat = x_nchw.reshape(N, Cin, HW)
    x_flat = jnp.pad(x_flat, ((0, 0), (0, Cin_pad - Cin), (0, HW_pad - HW)))
    x_flat = x_flat.astype(compute_dtype)

    # (Cout, Cin, 3, 3) -> (Cout_pad, 9*Cin_pad) im2col weights, tap-major.
    w = jnp.transpose(weight_oihw, (0, 2, 3, 1))          # (Cout, ky, kx, Cin)
    w = jnp.pad(w, ((0, Cout_pad - Cout), (0, 0), (0, 0), (0, Cin_pad - Cin)))
    w2d = w.reshape(Cout_pad, 9 * Cin_pad).astype(compute_dtype)
    b2d = jnp.pad(bias.astype(jnp.float32),
                  (0, Cout_pad - Cout)).reshape(Cout_pad, 1)

    # Precomputed row/col ids (keeps integer div/mod out of the kernel).
    ids = jnp.arange(HW_pad, dtype=jnp.int32)
    rc = jnp.stack([ids // W, ids % W], axis=0)           # (2, HW_pad) int32

    kernel = functools.partial(_conv3x3_kernel, H=H, W=W, HW_pad=HW_pad,
                               cin_rows=Cin_pad, nb=nb)

    out_dtype = x_nchw.dtype
    c_item = jnp.dtype(compute_dtype).itemsize
    o_item = jnp.dtype(out_dtype).itemsize

    block_bytes = (2 * HW_pad * 4                          # rc
                   + nb * Cin_pad * HW_pad * c_item        # x block
                   + c_rows * 9 * Cin_pad * c_item         # w block
                   + c_rows * 4                            # bias block
                   + nb * c_rows * HW_pad * o_item)        # out block
    scratch_bytes = nb * 9 * Cin_pad * HW_pad * c_item
    vmem_limit = int(min(max(4 * block_bytes + scratch_bytes + (2 << 20),
                             8 << 20), 32 << 20))

    flops = 2 * N * HW_pad * (9 * Cin_pad) * Cout_pad + N * HW_pad * Cout_pad
    bytes_accessed = (x_flat.size * c_item
                      + (N // nb) * (w2d.size * c_item + b2d.size * 4)
                      + rc.size * 4
                      + N * Cout_pad * HW_pad * o_item)
    cost = pl.CostEstimate(flops=flops, transcendentals=0,
                           bytes_accessed=bytes_accessed)

    out_flat = pl.pallas_call(
        kernel,
        out_shape=jax.ShapeDtypeStruct((N, Cout_pad, HW_pad), out_dtype),
        grid_spec=pltpu.PrefetchScalarGridSpec(
            num_scalar_prefetch=0,
            grid=(N // nb, n_ct),
            in_specs=[
                pl.BlockSpec((2, HW_pad), lambda n, c: (0, 0)),
                pl.BlockSpec((nb, Cin_pad, HW_pad), lambda n, c: (n, 0, 0)),
                pl.BlockSpec((c_rows, 9 * Cin_pad), lambda n, c: (c, 0)),
                pl.BlockSpec((c_rows, 1), lambda n, c: (c, 0)),
            ],
            out_specs=pl.BlockSpec((nb, c_rows, HW_pad), lambda n, c: (n, c, 0)),
            scratch_shapes=[pltpu.VMEM((nb, 9 * Cin_pad, HW_pad), compute_dtype)],
        ),
        compiler_params=pltpu.CompilerParams(
            # Batch tiles may split across cores; the Cout axis must stay
            # sequential so the im2col scratch built at c == 0 stays visible.
            dimension_semantics=("parallel", "arbitrary"),
            vmem_limit_bytes=vmem_limit,
        ),
        cost_estimate=cost,
    )(rc, x_flat, w2d, b2d)

    out = out_flat
    if Cout_pad != Cout or HW_pad != HW:
        out = out[:, :Cout, :HW]
    return out.reshape(N, Cout, H, W)


def _reference_conv(x_nchw, weight_oihw, bias):
    out = lax.conv_general_dilated(
        x_nchw, weight_oihw,
        window_strides=(1, 1), padding=((1, 1), (1, 1)),
        dimension_numbers=("NCHW", "OIHW", "NCHW"),
    )
    return out + bias[None, :, None, None]


if __name__ == "__main__":
    key = jax.random.PRNGKey(0)
    k_x, k_w, k_b, k_x2, k_w2, k_b2 = jax.random.split(key, 6)

    # --- Config 1: small shapes (batch=2, channels=4, spatial=16, Cout=8).
    N, Cin, H, W = 2, 4, 16, 16
    Cout = 8
    x = jax.random.normal(k_x, (N, Cin, H, W), dtype=jnp.float32)
    weight = jax.random.normal(k_w, (Cout, Cin, 3, 3), dtype=jnp.float32) * 0.1
    bias = jax.random.normal(k_b, (Cout,), dtype=jnp.float32) * 0.1
    ref = _reference_conv(x, weight, bias)

    # f32-operand path (matches nn.Conv2d numerics).
    out_f32 = jax.block_until_ready(
        normal_conv2d(x, weight, bias, compute_dtype=jnp.float32))
    assert out_f32.shape == (N, Cout, H, W)
    assert jnp.allclose(out_f32, ref, atol=1e-3, rtol=1e-3), \
        "f32 kernel mismatch vs reference"

    # Default bf16-operand path (f32 accumulation, native MXU dtype).
    out_bf16 = jax.block_until_ready(normal_conv2d(x, weight, bias))
    assert jnp.allclose(out_bf16, ref, atol=5e-2, rtol=5e-2), \
        "bf16 kernel mismatch vs reference"

    # --- Config 2: the spec's exact input shape (1, 3, 28, 28).
    N2, Cin2, H2, W2, Cout2 = 1, 3, 28, 28, 8
    x2 = jax.random.normal(k_x2, (N2, Cin2, H2, W2), dtype=jnp.float32)
    weight2 = jax.random.normal(k_w2, (Cout2, Cin2, 3, 3), dtype=jnp.float32) * 0.1
    bias2 = jax.random.normal(k_b2, (Cout2,), dtype=jnp.float32) * 0.1
    ref2 = _reference_conv(x2, weight2, bias2)

    out2 = jax.block_until_ready(normal_conv2d(x2, weight2, bias2))
    assert out2.shape == (N2, Cout2, H2, W2)
    assert jnp.allclose(out2, ref2, atol=5e-2, rtol=5e-2), \
        "bf16 kernel mismatch vs reference (28x28)"

    print("KERNEL_OK")
</pallas_src>

<mosaic_0001>
module attributes {stable_mosaic.version = 11 : i64} {
  func.func @_conv3x3_kernel(%arg0: i32, %arg1: i32, %arg2: memref<2x256xi32, #tpu.memory_space<vmem>>, %arg3: memref<1x8x256xf32, #tpu.memory_space<vmem>>, %arg4: memref<8x72xf32, #tpu.memory_space<vmem>>, %arg5: memref<8x1xf32, #tpu.memory_space<vmem>>, %arg6: memref<1x8x256xf32, #tpu.memory_space<vmem>>, %arg7: memref<1x72x256xf32, #tpu.memory_space<vmem>>) attributes {dimension_semantics = [#tpu.dimension_semantics<parallel>, #tpu.dimension_semantics<arbitrary>], iteration_bounds = array<i64: 2, 1>, scalar_prefetch = 0 : i64, scratch_operands = 1 : i64, tpu.core_type = #tpu.core_type<tc>, window_params = [{pipeline_mode = #tpu.pipeline_mode<synchronous>, transform_indices = @transform_0, window_bounds = array<i64: 2, 256>}, {transform_indices = @transform_1, window_bounds = array<i64: 1, 8, 256>}, {transform_indices = @transform_2, window_bounds = array<i64: 8, 72>}, {transform_indices = @transform_3, window_bounds = array<i64: 8, 1>}, {transform_indices = @transform_4, window_bounds = array<i64: 1, 8, 256>}]} {
    %c0_i32 = arith.constant 0 : i32
    %0 = arith.cmpi eq, %arg1, %c0_i32 : i32
    %1 = arith.extui %0 : i1 to i32
    %c0_i32_0 = arith.constant 0 : i32
    %2 = arith.cmpi ne, %1, %c0_i32_0 : i32
    scf.if %2 {
      %c0_10 = arith.constant 0 : index
      %c0_11 = arith.constant 0 : index
      %13 = vector.load %arg2[%c0_10, %c0_11] : memref<2x256xi32, #tpu.memory_space<vmem>>, vector<2x256xi32>
      %14 = vector.extract_strided_slice %13 {offsets = [0, 0], sizes = [1, 256], strides = [1, 1]} : vector<2x256xi32> to vector<1x256xi32>
      %15 = vector.extract_strided_slice %13 {offsets = [1, 0], sizes = [1, 256], strides = [1, 1]} : vector<2x256xi32> to vector<1x256xi32>
      %c1_i32 = arith.constant 1 : i32
      %16 = vector.broadcast %c1_i32 : i32 to vector<1x256xi32>
      %17 = arith.cmpi sge, %14, %16 : vector<1x256xi32>
      %c14_i32 = arith.constant 14 : i32
      %18 = vector.broadcast %c14_i32 : i32 to vector<1x256xi32>
      %19 = arith.cmpi sle, %14, %18 : vector<1x256xi32>
      %c1_i32_12 = arith.constant 1 : i32
      %20 = vector.broadcast %c1_i32_12 : i32 to vector<1x256xi32>
      %21 = arith.cmpi sge, %15, %20 : vector<1x256xi32>
      %c14_i32_13 = arith.constant 14 : i32
      %22 = vector.broadcast %c14_i32_13 : i32 to vector<1x256xi32>
      %23 = arith.cmpi sle, %15, %22 : vector<1x256xi32>
      %c0_14 = arith.constant 0 : index
      %c0_15 = arith.constant 0 : index
      %c0_16 = arith.constant 0 : index
      %24 = vector.load %arg3[%c0_14, %c0_15, %c0_16] : memref<1x8x256xf32, #tpu.memory_space<vmem>>, vector<1x8x256xf32>
      %25 = vector.shape_cast %24 : vector<1x8x256xf32> to vector<8x256xf32>
      %c17_i32 = arith.constant 17 : i32
      %26 = tpu.dynamic_rotate %25 by %c17_i32 dim 1 : vector<8x256xf32>, i32 -> vector<8x256xf32>
      %27 = arith.andi %17, %21 : vector<1x256xi1>
      %28 = vector.shape_cast %27 : vector<1x256xi1> to vector<1x256xi1>
      %29 = vector.broadcast %28 : vector<1x256xi1> to vector<8x256xi1>
      %cst_17 = arith.constant 0.000000e+00 : f32
      %30 = vector.broadcast %cst_17 : f32 to vector<8x256xf32>
      %31 = arith.select %29, %26, %30 : vector<8x256xi1>, vector<8x256xf32>
      %c0_18 = arith.constant 0 : index
      %c0_19 = arith.constant 0 : index
      %c0_20 = arith.constant 0 : index
      %32 = vector.load %arg7[%c0_18, %c0_19, %c0_20] : memref<1x72x256xf32, #tpu.memory_space<vmem>>, vector<1x8x256xf32>
      %33 = vector.shape_cast %32 : vector<1x8x256xf32> to vector<8x256xf32>
      %34 = vector.shape_cast %31 : vector<8x256xf32> to vector<1x8x256xf32>
      tpu.vector_store %arg7[%c0_18, %c0_19, %c0_20], %34 {strides = array<i32>} : memref<1x72x256xf32, #tpu.memory_space<vmem>>, vector<1x8x256xf32>,
      %c16_i32 = arith.constant 16 : i32
      %35 = tpu.dynamic_rotate %25 by %c16_i32 dim 1 : vector<8x256xf32>, i32 -> vector<8x256xf32>
      %36 = vector.shape_cast %17 : vector<1x256xi1> to vector<1x256xi1>
      %37 = vector.broadcast %36 : vector<1x256xi1> to vector<8x256xi1>
      %cst_21 = arith.constant 0.000000e+00 : f32
      %38 = vector.broadcast %cst_21 : f32 to vector<8x256xf32>
      %39 = arith.select %37, %35, %38 : vector<8x256xi1>, vector<8x256xf32>
      %c0_22 = arith.constant 0 : index
      %c8 = arith.constant 8 : index
      %c0_23 = arith.constant 0 : index
      %40 = vector.load %arg7[%c0_22, %c8, %c0_23] : memref<1x72x256xf32, #tpu.memory_space<vmem>>, vector<1x8x256xf32>
      %41 = vector.shape_cast %40 : vector<1x8x256xf32> to vector<8x256xf32>
      %42 = vector.shape_cast %39 : vector<8x256xf32> to vector<1x8x256xf32>
      tpu.vector_store %arg7[%c0_22, %c8, %c0_23], %42 {strides = array<i32>} : memref<1x72x256xf32, #tpu.memory_space<vmem>>, vector<1x8x256xf32>,
      %c15_i32 = arith.constant 15 : i32
      %43 = tpu.dynamic_rotate %25 by %c15_i32 dim 1 : vector<8x256xf32>, i32 -> vector<8x256xf32>
      %44 = arith.andi %17, %23 : vector<1x256xi1>
      %45 = vector.shape_cast %44 : vector<1x256xi1> to vector<1x256xi1>
      %46 = vector.broadcast %45 : vector<1x256xi1> to vector<8x256xi1>
      %cst_24 = arith.constant 0.000000e+00 : f32
      %47 = vector.broadcast %cst_24 : f32 to vector<8x256xf32>
      %48 = arith.select %46, %43, %47 : vector<8x256xi1>, vector<8x256xf32>
      %c0_25 = arith.constant 0 : index
      %c16 = arith.constant 16 : index
      %c0_26 = arith.constant 0 : index
      %49 = vector.load %arg7[%c0_25, %c16, %c0_26] : memref<1x72x256xf32, #tpu.memory_space<vmem>>, vector<1x8x256xf32>
      %50 = vector.shape_cast %49 : vector<1x8x256xf32> to vector<8x256xf32>
      %51 = vector.shape_cast %48 : vector<8x256xf32> to vector<1x8x256xf32>
      tpu.vector_store %arg7[%c0_25, %c16, %c0_26], %51 {strides = array<i32>} : memref<1x72x256xf32, #tpu.memory_space<vmem>>, vector<1x8x256xf32>,
      %c1_i32_27 = arith.constant 1 : i32
      %52 = tpu.dynamic_rotate %25 by %c1_i32_27 dim 1 : vector<8x256xf32>, i32 -> vector<8x256xf32>
      %53 = vector.shape_cast %21 : vector<1x256xi1> to vector<1x256xi1>
      %54 = vector.broadcast %53 : vector<1x256xi1> to vector<8x256xi1>
      %cst_28 = arith.constant 0.000000e+00 : f32
      %55 = vector.broadcast %cst_28 : f32 to vector<8x256xf32>
      %56 = arith.select %54, %52, %55 : vector<8x256xi1>, vector<8x256xf32>
      %c0_29 = arith.constant 0 : index
      %c24 = arith.constant 24 : index
      %c0_30 = arith.constant 0 : index
      %57 = vector.load %arg7[%c0_29, %c24, %c0_30] : memref<1x72x256xf32, #tpu.memory_space<vmem>>, vector<1x8x256xf32>
      %58 = vector.shape_cast %57 : vector<1x8x256xf32> to vector<8x256xf32>
      %59 = vector.shape_cast %56 : vector<8x256xf32> to vector<1x8x256xf32>
      tpu.vector_store %arg7[%c0_29, %c24, %c0_30], %59 {strides = array<i32>} : memref<1x72x256xf32, #tpu.memory_space<vmem>>, vector<1x8x256xf32>,
      %c0_31 = arith.constant 0 : index
      %c32 = arith.constant 32 : index
      %c0_32 = arith.constant 0 : index
      %60 = vector.load %arg7[%c0_31, %c32, %c0_32] : memref<1x72x256xf32, #tpu.memory_space<vmem>>, vector<1x8x256xf32>
      %61 = vector.shape_cast %60 : vector<1x8x256xf32> to vector<8x256xf32>
      %62 = vector.shape_cast %25 : vector<8x256xf32> to vector<1x8x256xf32>
      tpu.vector_store %arg7[%c0_31, %c32, %c0_32], %62 {strides = array<i32>} : memref<1x72x256xf32, #tpu.memory_space<vmem>>, vector<1x8x256xf32>,
      %c255_i32 = arith.constant 255 : i32
      %63 = tpu.dynamic_rotate %25 by %c255_i32 dim 1 : vector<8x256xf32>, i32 -> vector<8x256xf32>
      %64 = vector.shape_cast %23 : vector<1x256xi1> to vector<1x256xi1>
      %65 = vector.broadcast %64 : vector<1x256xi1> to vector<8x256xi1>
      %cst_33 = arith.constant 0.000000e+00 : f32
      %66 = vector.broadcast %cst_33 : f32 to vector<8x256xf32>
      %67 = arith.select %65, %63, %66 : vector<8x256xi1>, vector<8x256xf32>
      %c0_34 = arith.constant 0 : index
      %c40 = arith.constant 40 : index
      %c0_35 = arith.constant 0 : index
      %68 = vector.load %arg7[%c0_34, %c40, %c0_35] : memref<1x72x256xf32, #tpu.memory_space<vmem>>, vector<1x8x256xf32>
      %69 = vector.shape_cast %68 : vector<1x8x256xf32> to vector<8x256xf32>
      %70 = vector.shape_cast %67 : vector<8x256xf32> to vector<1x8x256xf32>
      tpu.vector_store %arg7[%c0_34, %c40, %c0_35], %70 {strides = array<i32>} : memref<1x72x256xf32, #tpu.memory_space<vmem>>, vector<1x8x256xf32>,
      %c241_i32 = arith.constant 241 : i32
      %71 = tpu.dynamic_rotate %25 by %c241_i32 dim 1 : vector<8x256xf32>, i32 -> vector<8x256xf32>
      %72 = arith.andi %19, %21 : vector<1x256xi1>
      %73 = vector.shape_cast %72 : vector<1x256xi1> to vector<1x256xi1>
      %74 = vector.broadcast %73 : vector<1x256xi1> to vector<8x256xi1>
      %cst_36 = arith.constant 0.000000e+00 : f32
      %75 = vector.broadcast %cst_36 : f32 to vector<8x256xf32>
      %76 = arith.select %74, %71, %75 : vector<8x256xi1>, vector<8x256xf32>
      %c0_37 = arith.constant 0 : index
      %c48 = arith.constant 48 : index
      %c0_38 = arith.constant 0 : index
      %77 = vector.load %arg7[%c0_37, %c48, %c0_38] : memref<1x72x256xf32, #tpu.memory_space<vmem>>, vector<1x8x256xf32>
      %78 = vector.shape_cast %77 : vector<1x8x256xf32> to vector<8x256xf32>
      %79 = vector.shape_cast %76 : vector<8x256xf32> to vector<1x8x256xf32>
      tpu.vector_store %arg7[%c0_37, %c48, %c0_38], %79 {strides = array<i32>} : memref<1x72x256xf32, #tpu.memory_space<vmem>>, vector<1x8x256xf32>,
      %c240_i32 = arith.constant 240 : i32
      %80 = tpu.dynamic_rotate %25 by %c240_i32 dim 1 : vector<8x256xf32>, i32 -> vector<8x256xf32>
      %81 = vector.shape_cast %19 : vector<1x256xi1> to vector<1x256xi1>
      %82 = vector.broadcast %81 : vector<1x256xi1> to vector<8x256xi1>
      %cst_39 = arith.constant 0.000000e+00 : f32
      %83 = vector.broadcast %cst_39 : f32 to vector<8x256xf32>
      %84 = arith.select %82, %80, %83 : vector<8x256xi1>, vector<8x256xf32>
      %c0_40 = arith.constant 0 : index
      %c56 = arith.constant 56 : index
      %c0_41 = arith.constant 0 : index
      %85 = vector.load %arg7[%c0_40, %c56, %c0_41] : memref<1x72x256xf32, #tpu.memory_space<vmem>>, vector<1x8x256xf32>
      %86 = vector.shape_cast %85 : vector<1x8x256xf32> to vector<8x256xf32>
      %87 = vector.shape_cast %84 : vector<8x256xf32> to vector<1x8x256xf32>
      tpu.vector_store %arg7[%c0_40, %c56, %c0_41], %87 {strides = array<i32>} : memref<1x72x256xf32, #tpu.memory_space<vmem>>, vector<1x8x256xf32>,
      %c239_i32 = arith.constant 239 : i32
      %88 = tpu.dynamic_rotate %25 by %c239_i32 dim 1 : vector<8x256xf32>, i32 -> vector<8x256xf32>
      %89 = arith.andi %19, %23 : vector<1x256xi1>
      %90 = vector.shape_cast %89 : vector<1x256xi1> to vector<1x256xi1>
      %91 = vector.broadcast %90 : vector<1x256xi1> to vector<8x256xi1>
      %cst_42 = arith.constant 0.000000e+00 : f32
      %92 = vector.broadcast %cst_42 : f32 to vector<8x256xf32>
      %93 = arith.select %91, %88, %92 : vector<8x256xi1>, vector<8x256xf32>
      %c0_43 = arith.constant 0 : index
      %c64 = arith.constant 64 : index
      %c0_44 = arith.constant 0 : index
      %94 = vector.load %arg7[%c0_43, %c64, %c0_44] : memref<1x72x256xf32, #tpu.memory_space<vmem>>, vector<1x8x256xf32>
      %95 = vector.shape_cast %94 : vector<1x8x256xf32> to vector<8x256xf32>
      %96 = vector.shape_cast %93 : vector<8x256xf32> to vector<1x8x256xf32>
      tpu.vector_store %arg7[%c0_43, %c64, %c0_44], %96 {strides = array<i32>} : memref<1x72x256xf32, #tpu.memory_space<vmem>>, vector<1x8x256xf32>,
    } else {
    }
    %c0 = arith.constant 0 : index
    %c0_1 = arith.constant 0 : index
    %3 = vector.load %arg4[%c0, %c0_1] : memref<8x72xf32, #tpu.memory_space<vmem>>, vector<8x72xf32>
    %c0_2 = arith.constant 0 : index
    %c0_3 = arith.constant 0 : index
    %c0_4 = arith.constant 0 : index
    %4 = vector.load %arg7[%c0_2, %c0_3, %c0_4] : memref<1x72x256xf32, #tpu.memory_space<vmem>>, vector<1x72x256xf32>
    %5 = vector.shape_cast %4 : vector<1x72x256xf32> to vector<72x256xf32>
    %cst = arith.constant dense<0.000000e+00> : vector<8x256xf32>
    %6 = tpu.matmul %3, %5, %cst {dimension_numbers = #tpu.dot_dimension_numbers<[1], [0], [0], [1], [0, 0, 1, 1], [], []>} : vector<8x72xf32>, vector<72x256xf32>, vector<8x256xf32> -> vector<8x256xf32>
    %c0_5 = arith.constant 0 : index
    %c0_6 = arith.constant 0 : index
    %7 = vector.load %arg5[%c0_5, %c0_6] : memref<8x1xf32, #tpu.memory_space<vmem>>, vector<8x1xf32>
    %8 = vector.broadcast %7 : vector<8x1xf32> to vector<8x256xf32>
    %9 = arith.addf %6, %8 : vector<8x256xf32>
    %c0_7 = arith.constant 0 : index
    %c0_8 = arith.constant 0 : index
    %c0_9 = arith.constant 0 : index
    %10 = vector.load %arg6[%c0_7, %c0_8, %c0_9] : memref<1x8x256xf32, #tpu.memory_space<vmem>>, vector<1x8x256xf32>
    %11 = vector.shape_cast %10 : vector<1x8x256xf32> to vector<8x256xf32>
    %12 = vector.shape_cast %9 : vector<8x256xf32> to vector<1x8x256xf32>
    tpu.vector_store %arg6[%c0_7, %c0_8, %c0_9], %12 {strides = array<i32>} : memref<1x8x256xf32, #tpu.memory_space<vmem>>, vector<1x8x256xf32>,
    return
  }
  func.func @transform_0(%arg0: i32, %arg1: i32) -> (i32, i32) {
    %c0_i32 = arith.constant 0 : i32
    %c0_i32_0 = arith.constant 0 : i32
    %c0_i32_1 = arith.constant 0 : i32
    return %c0_i32, %c0_i32_0 : i32, i32
  }
  func.func @transform_1(%arg0: i32, %arg1: i32) -> (i32, i32, i32) {
    %c0_i32 = arith.constant 0 : i32
    %c0_i32_0 = arith.constant 0 : i32
    %c0_i32_1 = arith.constant 0 : i32
    return %arg0, %c0_i32, %c0_i32_0 : i32, i32, i32
  }
  func.func @transform_2(%arg0: i32, %arg1: i32) -> (i32, i32) {
    %c0_i32 = arith.constant 0 : i32
    %c0_i32_0 = arith.constant 0 : i32
    return %arg1, %c0_i32 : i32, i32
  }
  func.func @transform_3(%arg0: i32, %arg1: i32) -> (i32, i32) {
    %c0_i32 = arith.constant 0 : i32
    %c0_i32_0 = arith.constant 0 : i32
    return %arg1, %c0_i32 : i32, i32
  }
  func.func @transform_4(%arg0: i32, %arg1: i32) -> (i32, i32, i32) {
    %c0_i32 = arith.constant 0 : i32
    %c0_i32_0 = arith.constant 0 : i32
    return %arg0, %arg1, %c0_i32 : i32, i32, i32
  }
}

</mosaic_0001>

<bundles_post_ra>
// kernel: tpu_custom_call.1
= control target key start
LH: loop header
LB: loop body
LE: loop exit
PB: predicated region body
PF: predicated region fallthrough
CT: control target
= control target key end

     0   :  { %9 = vsyncpa [#allocation4], 0  ;;  %s1409_s0 = inlined_call_operand.vmem [shape: s32[2,256], index: 0, kind: input, shape index: {}]   ;;  %s1410_s1 = inlined_call_operand.hbm [shape: f32[2,8,256], index: 1, kind: input, shape index: {}]   ;;  %s1411_s2 = inlined_call_operand.vmem [shape: f32[8,72], index: 2, kind: input, shape index: {}]   ;;  %s1412_s3 = inlined_call_operand.vmem [shape: f32[8,1], index: 3, kind: input, shape index: {}]   ;;  %s1413_s4 = inlined_call_operand.hbm [shape: f32[2,8,256], index: 4, kind: output, shape index: {}]  }
   0x1   :  { %11 = vsyncpa [#allocation4 + $0x1], 0 }
   0x2   :  { %12 = vsyncpa [#allocation5], 0 }
   0x3   :  { %14 = vsyncpa [#allocation5 + $0x1], 0  ;;  %s1077_s15 = smov 0   ;;  %s1079_s16 = smov 0  }
   0x4   :  { %s1081_s17 = smov 0   ;;  %s1083_s18 = smov 0  }
   0x5   :  { %s1085_s19 = smov 0   ;;  %s1087_s20 = smov 0  }
   0x6 LB: > { %s753_s21 = sadd.s32 4294967295, %s1037_s20   ;;  %s754_s22 = sadd.s32 4294967294, %s1037_s20   ;;  %s1037_s20 = sphi %s1087_s20, %s20_s20   ;;  %s1033_s19 = sphi %s1085_s19, %s1439_s19   ;;  %s1029_s18 = sphi %s1083_s18, %s1438_s18   ;;  %s1025_s17 = sphi %s1081_s17, %s1437_s17   ;;  %s1021_s16 = sphi %s1079_s16, %s1436_s16   ;;  %s1017_s15 = sphi %s1077_s15, %s1435_s15  }
   0x7   : > { %s32_s23 = sadd.s32 1, %s1033_s19  ;;  %s60_s24 = sadd.s32 1, %s1025_s17 }
   0x8   : > { %p34_p0 = scmp.ge.s32.totalorder %s32_s23, 2  ;;  %p67_p1 = scmp.ne.s32.totalorder %s1025_s17, %s1021_s16 }
   0x9   : > { %p68_p2 = scmp.eq.s32.totalorder %s1037_s20, 0  ;;  %p73_p3 = scmp.ne.s32.totalorder %s1021_s16, %s1017_s15 }
   0xa   : > { %s1441_s23 = smov (%p34_p0, %s32_s23), 0  ;;  %p74_p5 = scmp.eq.s32.totalorder %s753_s21, 0 }
   0xb   : > { %p1118_p4 = por %p68_p2, %p67_p1  ;;  %s57_s26 = ssub.s32 %s1033_s19, %s1441_s23 }
   0xc   : > { %p151_p6 = scmp.eq.s32.totalorder %s753_s21, 1  ;;  %p58_p7 = scmp.eq.s32.totalorder %s57_s26, 0 }
   0xd   : > { %p1124_p8 = por %p74_p5, %p73_p3  ;;  %p157_p10 = scmp.eq.s32.totalorder %s754_s22, 1 }
   0xe   : > { %p1128_p9 = por %p151_p6, %p67_p1  ;;  %p827_p13 = scmp.lt.s32.totalorder %s1037_s20, 2 }
   0xf   : > { %s1133_s29 = scalar_select %p58_p7, %s1025_s17, %s60_s24  }
  0x10   : > { %s1417_s28 = scalar_select %p1128_p9, 1, 0 }
  0x11   : > { %p1135_p11 = por %p157_p10, %p73_p3  ;;  %s194_s5 = sand.u32 1, %s1025_s17  }
  0x12   : > { %s759_s6 = sshll.u32 %s194_s5, 4  ;;  %s773_s7 = sshll.u32 %s1033_s19, 8 }
  0x13   : > { %s1418_s30 = scalar_select %p1135_p11, 1, 0 }
  0x14   : > { %s1146_s10 = scalar_lea.hbm %s1410_s1, %s773_s7  ;;  %s198_s11 = scalar_lea.vmem [#allocation3], %s759_s6 }
  0x15   : > { %s206_s12 = sshll.u32 %s198_s11, 4  ;;  %p1152_p0 = pnand %p827_p13, %p1118_p4  ;;  %s1148_s12 = int_to_ptr.vmem [resolvable:$true] %s206_s12 }
  0x16   : > { %s195_s14 = scalar_lea.sflag [#allocation4], %s194_s5  ;;  %s925_s21 = scalar_lea.hbm %s1146_s10, 256 }
  0x17   : > { %p926_p3 = scmp.ne.s32.totalorder %s1146_s10, %s925_s21  ;;  %p927_p5 = pneg %p1152_p0 }
  0x18   : > { %s930_s25 = scalar_lea.hbm %s1410_s1, 512  ;;  %p931_p4 = scmp.lt.u32.totalorder %s1146_s10, %s1410_s1 }
  0x19   : > { %p928_p6 = pnand %p927_p5, %p926_p3  ;;  %p932_p10 = scmp.lt.u32.totalorder %s930_s25, %s925_s21 }
  0x1a   : > { %p934_p12 = scmp.lt.u32.totalorder %s925_s21, %s1146_s10 }
  0x1b   : > { %p929_p7 = pneg %p928_p6  ;;  %p933_p13 = por %p932_p10, %p931_p4 }
  0x1d   : > { %p935_p1 = por %p934_p12, %p933_p13 }
  0x1f   : > { %p936_p2 = pnand %p935_p1, %p929_p7 }
  0x21   : > { %939 = shalt.err (!%p936_p2)
}
  0x22   : > { %s940_s5 = scalar_lea.vmem %s1148_s12, 256  ;;  %s1039_s7 = smov [#allocation3]  }
  0x23   : > { %p941_p3 = scmp.ne.s32.totalorder %s1148_s12, %s940_s5  ;;  %s945_s8 = sshll.u32 %s1039_s7, 4  ;;  %s946_s8 = int_to_ptr.vmem [resolvable:$false] %s945_s8 }
  0x24   : > { %s947_s9 = scalar_lea.vmem %s946_s8, 512  ;;  %p948_p9 = scmp.lt.s32.totalorder %s1148_s12, %s946_s8 }
  0x25   : > { %p943_p6 = pnand %p941_p3, %p927_p5  ;;  %p949_p4 = scmp.lt.s32.totalorder %s947_s9, %s940_s5 }
  0x27   : > { %p944_p11 = pneg %p943_p6  ;;  %p950_p10 = por %p949_p4, %p948_p9 }
  0x29   : > { %p951_p12 = pnand %p950_p10, %p944_p11 }
  0x2b   : > { %954 = shalt.err (!%p951_p12)
}
  0x2c   : > { %822 = dma.hbm_to_vmem [thread:$0]  (!%p1152_p0), %s1146_s10, 256, %s1148_s12, %s195_s14  }
  0x2d   : > { %p1420_p1 = scmp.lt.s32.totalorder %s1037_s20, 3  ;;  %p1421_p2 = scmp.ge.s32.totalorder %s1037_s20, 1 }
  0x2f   : > { %p212_p5 = pnand %p1421_p2, %p1420_p1 }
  0x30   : > { %s1188_s11 = sand.u32 (!%p212_p5), 1, %s1021_s16  }
  0x31   : > { %215 = sbr.rel (%p212_p5) target bundleno = 431 (0x1af), region = 36  ;;  %s763_s21 = sshll.u32 (!%p212_p5), %s1188_s11, 4 }
  0x32   : > { %s218_s22 = scalar_lea.sflag (!%p212_p5), [#allocation4], %s1188_s11  ;;  %s221_s13 = scalar_lea.vmem (!%p212_p5), [#allocation3], %s763_s21 }
  0x38   : > { %1008 = dma.done.wait (%p1124_p8), %s218_s22, 256  }
  0x39   : > { %1010 = vsyncadd (%p1124_p8), %s218_s22, 4294967040  ;;  %v1040_v0 = vmov 0   ;;  %v1200_v1 = vld [vmem:[%s221_s13] sm:$0xff]  ;;  %v1202_v2 = vld [vmem:[%s221_s13 + $0x8] sm:$0xff]  ;;  %s1041_s10 = smov 15   ;;  %s1042_s12 = smov 17   ;;  %v275_v8 = vlaneseq }
  0x3a   : > { %923 = vset.pattern.permute.xlu1 %v1040_v0  ;;  %924 = vset.pattern.permute.xlu0 %v1040_v0  ;;  %v898_v3 = vpack.i.bf16 %v1202_v2, %v1200_v1  ;;  %s1043_s14 = smov 1   ;;  %s1044_s27 = smov 16   ;;  %v542_v4 = vld [vmem:[%s1412_s3] sm:$0xff]  ;;  %v1049_v5 = vmov 0.0  }
  0x3b   : > { %s1045_s24 = smov 127   ;;  %s1046_s25 = smov 113   ;;  %616 = vmatprep.mubr.f32.mxu0 %v1049_v5  ;;  %v266_v6 = vld [vmem:[%s1409_s0] sm:$0xf]  ;;  %v287_v11 = vshrl.u32 %v275_v8, 7  ;;  %v1236_v23 = vand.u32 127, %v275_v8 }
  0x3c   : > { %899 = vrot.lane.b32.xlu1 %v898_v3, %s1041_s10  ;;  %889 = vrot.lane.b32.xlu0 %v898_v3, %s1042_s12  ;;  %s1047_s26 = smov 112   ;;  %s1048_s6 = smov 111   ;;  %vm267_vm0 = vcmp.ge.s32.totalorder %v266_v6, 1  ;;  %vm268_vm1 = vcmp.le.s32.totalorder %v266_v6, 14  ;;  %v523_v43 = vld [vmem:[%s1411_s2] sm:$0xff] }
  0x3d   : > { %v280_v7 = vsel %vm267_vm0, 1, %v1040_v0  ;;  %v1218_v9 = vsel %vm268_vm1, 1, %v1040_v0  ;;  %v1221_v13 = vsub.s32 0, %v287_v11  ;;  %v1223_v14 = vsub.s32 2, %v287_v11  ;;  %s774_s10 = sshll.u32 %s1029_s18, 8  ;;  %s253_s12 = scalar_lea.vmem [#allocation6], %s763_s21 }
  0x3e   : > { %v765_v10 = vrot.slane %v280_v7, 9  ;;  %v766_v12 = vrot.slane %v1218_v9, 9  ;;  %v381_v16 = vsub.s32 1, %v287_v11  ;;  %v385_v17 = vsub.s32 3, %v287_v11  ;;  %s626_s18 = scalar_lea.sflag [#allocation5], %s1188_s11  ;;  %p1432_p9 = scmp.ne.s32.totalorder %s1417_s28, 0 }
  0x3f   : > { %v322_v19 = vrot.slane %v280_v7, %v1223_v14  ;;  %v318_v20 = vrot.slane %v280_v7, %v1221_v13  ;;  %vm341_vm7 = vcmp.lt.s32.totalorder %v1236_v23, 15  ;;  %vm376_vm8 = vcmp.lt.s32.totalorder %v1236_v23, 1  ;;  %s1051_s21 = smov [#allocation6]  }
  0x40   : > { %904 = vrot.lane.b32.xlu1 %v898_v3, %s1043_s14  ;;  %894 = vrot.lane.b32.xlu0 %v898_v3, %s1044_s27  ;;  %vm283_vm2 = vcmp.ne.s32.totalorder %v765_v10, 0  ;;  %vm1225_vm3 = vcmp.ne.s32.totalorder %v766_v12, 0  ;;  %v386_v21 = vrot.slane %v280_v7, %v385_v17  ;;  %v382_v22 = vrot.slane %v280_v7, %v381_v16  ;;  %s642_s14 = sshll.u32 %s253_s12, 4  ;;  %s1362_s14 = int_to_ptr.vmem [resolvable:$true] %s642_s14 }
  0x41   : > { %vm284_vm4 = vmand %vm267_vm0, %vm283_vm2  ;;  %v417_v26 = vrot.slane %v1218_v9, %v385_v17  ;;  %v330_v27 = vrot.slane %v322_v19, %v1221_v13  ;;  %v326_v29 = vrot.slane %v318_v20, %v1221_v13  ;;  %vm277_vm9 = vcmp.lt.s32.totalorder %v1236_v23, 17 }
  0x42   : > { %vm348_vm5 = vmand %vm267_vm0, %vm1225_vm3  ;;  %v285_v18 = vsel %vm284_vm4, 1, %v1040_v0  ;;  %v394_v31 = vrot.slane %v386_v21, %v381_v16  ;;  %v1246_v32 = vrot.slane %v382_v22, %v381_v16  ;;  %vm312_vm10 = vcmp.lt.s32.totalorder %v1236_v23, 16 }
  0x43   : > { %vm439_vm6 = vmand %vm268_vm1, %vm283_vm2  ;;  %v349_v24 = vsel %vm348_vm5, 1, %v1040_v0  ;;  %v293_v25 = vrot.slane %v285_v18, %v1223_v14  ;;  %v289_v28 = vrot.slane %v285_v18, %v1221_v13  ;;  %v425_v35 = vrot.slane %v417_v26, %v381_v16 }
  0x44   : > { %909 = vrot.lane.b32.xlu0 %v898_v3, %s1045_s24  ;;  %914 = vrot.lane.b32.xlu1 %v898_v3, %s1046_s25  ;;  %v357_v30 = vrot.slane %v349_v24, %v1223_v14  ;;  %v1249_v33 = vsel %vm439_vm6, 1, %v1040_v0  ;;  %v413_v36 = vrot.slane %v1218_v9, %v381_v16  ;;  %vm332_vm11 = vcmp.eq.s32.totalorder %v330_v27, 1  ;;  %vm499_vm13 = vmand %vm268_vm1, %vm1225_vm3  ;;  %s1360_s25 = scalar_lea.hbm %s1413_s4, %s774_s10 }
  0x45   : > { %v301_v34 = vrot.slane %v293_v25, %v1221_v13  ;;  %v297_v39 = vrot.slane %v289_v28, %v1221_v13  ;;  %vm407_vm12 = vcmp.lt.s32.totalorder %v1236_v23, 127  ;;  %v353_v40 = vrot.slane %v349_v24, %v1221_v13 }
  0x46   : > { %v448_v41 = vrot.slane %v1249_v33, %v1223_v14  ;;  %vm331_vm14 = vcmp.eq.s32.totalorder %v326_v29, 1  ;;  %v365_v42 = vrot.slane %v357_v30, %v1221_v13  ;;  %vm1266_vm15 = vcmp.eq.s32.totalorder %v394_v31, 1 }
  0x47   : > { %vm395_vm0 = vcmp.eq.s32.totalorder %v1246_v32, 1  ;;  %vm303_vm4 = vcmp.eq.s32.totalorder %v301_v34, 1  ;;  %vm1272_vm5 = vcmp.eq.s32.totalorder %v425_v35, 1  ;;  %v1276_v49 = vrot.slane %v413_v36, %v381_v16 }
  0x48   : > { %919 = vrot.lane.b32.xlu0 %v898_v3, %s1047_s26  ;;  %492 = vrot.lane.b32.xlu1 %v1200_v1, %s1048_s6  ;;  %v1279_v50 = vsel %vm499_vm13, 1, %v1040_v0  ;;  %vm302_vm1 = vcmp.eq.s32.totalorder %v297_v39, 1  ;;  %v361_v53 = vrot.slane %v353_v40, %v1221_v13  ;;  %v456_v54 = vrot.slane %v448_v41, %v1221_v13  ;;  %vm1297_vm6 = vmpackc.low %vm332_vm11, %vm303_vm4  ;;  %s955_s26 = scalar_lea.vmem %s1362_s14, 256 }
  0x49   : > { %v477_v55 = vrot.slane %v1218_v9, %v1223_v14  ;;  %vm367_vm3 = vcmp.eq.s32.totalorder %v365_v42, 1  ;;  %v444_v62 = vrot.slane %v1249_v33, %v1221_v13  ;;  %vm795_vm13 = vmpackc.low %vm331_vm14, %vm302_vm1  ;;  %v473_v11 = vrot.slane %v1218_v9, %v1221_v13  ;;  %p956_p8 = scmp.ne.s32.totalorder %s1362_s14, %s955_s26 }
  0x4a   : > { %vm366_vm2 = vcmp.eq.s32.totalorder %v361_v53, 1  ;;  %vm426_vm11 = vcmp.eq.s32.totalorder %v1276_v49, 1  ;;  %v508_v28 = vrot.slane %v1279_v50, %v1223_v14  ;;  %v504_v36 = vrot.slane %v1279_v50, %v1221_v13 }
  0x4b   : > { %v485_v9 = vrot.slane %v477_v55, %v1221_v13  ;;  %v452_v22 = vrot.slane %v444_v62, %v1221_v13  ;;  %v481_v27 = vrot.slane %v473_v11, %v1221_v13  ;;  %p957_p11 = pnand %p956_p8, %p1432_p9 }
  0x4c   : > { %494 = vrot.lane.b32.xlu0 %v1202_v2, %s1048_s6  ;;  %545 = vperm.xlu1 %923, %v542_v4   ;;  %v512_v40 = vrot.slane %v504_v36, %v1221_v13  ;;  %s959_s6 = sshll.u32 %s1051_s21, 4  ;;  %s960_s6 = int_to_ptr.vmem [resolvable:$false] %s959_s6 }
  0x4d   : > { %vm487_vm4 = vcmp.eq.s32.totalorder %v485_v9, 1  ;;  %vm457_vm1 = vcmp.eq.s32.totalorder %v452_v22, 1  ;;  %p958_p0 = pneg %p957_p11  ;;  %s961_s5 = scalar_lea.vmem %s960_s6, 512 }
  0x4e   : > { %p962_p7 = scmp.lt.s32.totalorder %s1362_s14, %s960_s6  ;;  %p963_p13 = scmp.lt.s32.totalorder %s961_s5, %s955_s26 }
  0x50   : > { %p964_p3 = por %p963_p13, %p962_p7 }
  0x52   : > { %p965_p6 = pnand %p964_p3, %p958_p0 }
  0xae   : > { %v900_v37 = vpop.permute.xlu1 %899  ;;  %v890_v38 = vpop.permute.xlu0 %889 }
  0xaf   : > { %v902_v44 = vunpack.i.h.bf16 %v900_v37  ;;  %v901_v45 = vunpack.i.l.bf16 %v900_v37  ;;  %v892_v46 = vunpack.i.h.bf16 %v890_v38  ;;  %v891_v47 = vunpack.i.l.bf16 %v890_v38 }
  0xb1   : > { %v342_v60 = vsel %vm341_vm7, %v901_v45, %v902_v44  ;;  %v278_v61 = vsel %vm277_vm9, %v891_v47, %v892_v46  ;;  %v279_v4 = vsel %vm277_vm9, %v892_v46, %v891_v47  ;;  %vm798_vm9 = vmpackc.low %vm1266_vm15, %vm367_vm3  ;;  %v343_v18 = vsel %vm341_vm7, %v902_v44, %v901_v45 }
  0xb2   : > { %v905_v51 = vpop.permute.xlu1 %904  ;;  %v895_v52 = vpop.permute.xlu0 %894  ;;  %vm801_vm7 = vmpackc.low %vm395_vm0, %vm366_vm2  ;;  %vm458_vm15 = vcmp.eq.s32.totalorder %v456_v54, 1  ;;  %vm486_vm3 = vcmp.eq.s32.totalorder %v481_v27, 1 }
  0xb3   : > { %v907_v56 = vunpack.i.h.bf16 %v905_v51  ;;  %v906_v57 = vunpack.i.l.bf16 %v905_v51  ;;  %v897_v58 = vunpack.i.h.bf16 %v895_v52  ;;  %v896_v59 = vunpack.i.l.bf16 %v895_v52 }
  0xb5   : > { %v377_v63 = vsel %vm376_vm8, %v906_v57, %v907_v56  ;;  %v313_v0 = vsel %vm312_vm10, %v896_v59, %v897_v58  ;;  %v314_v5 = vsel %vm312_vm10, %v897_v58, %v896_v59  ;;  %v378_v19 = vsel %vm376_vm8, %v907_v56, %v906_v57 }
  0xb6   : > { %v791_v6 = vpack.c.bf16 %v313_v0, %v278_v61  ;;  %v794_v7 = vpack.c.bf16 %v314_v5, %v279_v4  ;;  %v910_v8 = vpop.permute.xlu0 %909  ;;  %v915_v10 = vpop.permute.xlu1 %914  ;;  %v797_v20 = vpack.c.bf16 %v377_v63, %v342_v60  ;;  %vm467_vm10 = vcmp.lt.s32.totalorder %v1236_v23, 112 }
  0xb7   : > { %v912_v12 = vunpack.i.h.bf16 %v910_v8  ;;  %v911_v15 = vunpack.i.l.bf16 %v910_v8  ;;  %v917_v16 = vunpack.i.h.bf16 %v915_v10  ;;  %v916_v17 = vunpack.i.l.bf16 %v915_v10 }
  0xb8   : > { %793 = vmatprep.subr.msk.bf16.mxu0 %vm1297_vm6, %v791_v6  ;;  %v800_v29 = vpack.c.bf16 %v378_v19, %v343_v18  ;;  %vm1430_vm8 = vcmp.lt.s32.totalorder %v1236_v23, 113  ;;  %vm496_vm6 = vcmp.lt.s32.totalorder %v1236_v23, 111 }
  0xb9   : > { %796 = vmatpush1.bf16.msk.msra.mxu0 %vm795_vm13, %v794_v7  ;;  %v409_v21 = vsel %vm407_vm12, %v912_v12, %v911_v15  ;;  %v408_v24 = vsel %vm407_vm12, %v911_v15, %v912_v12  ;;  %v438_v30 = vsel %vm1430_vm8, %v917_v16, %v916_v17  ;;  %vm1050_vm12 = vmmov 1   ;;  %vm1431_vm0 = vmmov %vm1430_vm8 }
  0xba   : > { %v803_v25 = vpack.c.bf16 %v409_v21, %v1202_v2  ;;  %799 = vmatprep.subr.msk.bf16.mxu0 %vm798_vm9, %v797_v20  ;;  %v920_v26 = vpop.permute.xlu0 %919  ;;  %vm804_vm14 = vmpackc.low %vm1272_vm5, %vm1050_vm12  ;;  %v806_v2 = vpack.c.bf16 %v408_v24, %v1200_v1  ;;  %v437_v14 = vsel %vm1431_vm0, %v916_v17, %v917_v16  ;;  %v516_v1 = vrot.slane %v508_v28, %v1221_v13  ;;  %v493_v37 = vpop.permute.xlu1 %492 }
  0xbb   : > { %v922_v31 = vunpack.i.h.bf16 %v920_v26  ;;  %v921_v33 = vunpack.i.l.bf16 %v920_v26  ;;  %vm807_vm2 = vmpackc.low %vm426_vm11, %vm1050_vm12  ;;  %vm548_vm11 = vcmask 588800  }
  0xbc   : > { %vm810_vm5 = vmpackc.low %vm487_vm4, %vm458_vm15  ;;  %vm518_vm9 = vcmp.eq.s32.totalorder %v516_v1, 1 }
  0xbd   : > { %802 = vmatpush1.bf16.msk.msra.mxu0 %vm801_vm7, %v800_v29  ;;  %v469_v32 = vsel %vm467_vm10, %v922_v31, %v921_v33  ;;  %v468_v34 = vsel %vm467_vm10, %v921_v33, %v922_v31  ;;  %vm813_vm13 = vmpackc.low %vm486_vm3, %vm457_vm1  ;;  %vm517_vm10 = vcmp.eq.s32.totalorder %v512_v40, 1 }
  0xbe   : > { %v809_v35 = vpack.c.bf16 %v469_v32, %v438_v30  ;;  %805 = vmatprep.subr.msk.bf16.mxu0 %vm804_vm14, %v803_v25  ;;  %v495_v38 = vpop.permute.xlu0 %494  ;;  %v812_v39 = vpack.c.bf16 %v468_v34, %v437_v14 }
  0xbf   : > { %v498_v41 = vsel %vm496_vm6, %v495_v38, %v493_v37  ;;  %v497_v42 = vsel %vm496_vm6, %v493_v37, %v495_v38 }
  0xc1   : > { %808 = vmatpush1.bf16.msk.msra.mxu0 %vm807_vm2, %v806_v2 }
  0xc2   : > { %811 = vmatprep.subr.msk.bf16.mxu0 %vm810_vm5, %v809_v35 }
  0xc5   : > { %814 = vmatpush1.bf16.msk.msra.mxu0 %vm813_vm13, %v812_v39 }
  0xc6   : > { %789 = vmatprep.subr.msk.mxu0 %vm518_vm9, %v498_v41 }
  0xc9   : > { %790 = vmatpush1.msk.msra.mxu0 %vm517_vm10, %v497_v42 }
  0xca   : > { %767 = vmatmul.mubr.msk.f32.vlgmr.msra.gmra.mrb[0].mxu0 %vm548_vm11, %v523_v43 }
  0xcb   : > { %v546_v23 = vpop.permute.xlu1 %545 }
 0x19d   : > { %v618_v13 = vpop.f32.mrb[0].mxu0 }
 0x19e   : > { %v619_v44 = vadd.f32 %v618_v13, %v546_v23  ;;  %v620_v45 = vpop.f32.mrb[1].mxu0 }
 0x19f   : > { %v621_v46 = vadd.f32 %v620_v45, %v546_v23 }
 0x1a0   : > { %623 = vst [vmem:[%s253_s12] sm:$0xff] %v619_v44 }
 0x1a1   : > { %624 = vst [vmem:[%s253_s12 + $0x8] sm:$0xff] %v621_v46 }
 0x1a2   : > { %968 = shalt.err (!%p965_p6)
}
 0x1a3   : > { %s969_s11 = scalar_lea.hbm %s1360_s25, 256  ;;  %s973_s9 = scalar_lea.hbm %s1413_s4, 512 }
 0x1a4   : > { %p970_p4 = scmp.ne.s32.totalorder %s1360_s25, %s969_s11  ;;  %p974_p1 = scmp.lt.u32.totalorder %s1360_s25, %s1413_s4 }
 0x1a5   : > { %p975_p2 = scmp.lt.u32.totalorder %s973_s9, %s969_s11  ;;  %p977_p8 = scmp.lt.u32.totalorder %s969_s11, %s1360_s25 }
 0x1a6   : > { %p971_p10 = pnand %p970_p4, %p1432_p9 }
 0x1a7   : > { %p976_p5 = por %p975_p2, %p974_p1 }
 0x1a8   : > { %p972_p12 = pneg %p971_p10 }
 0x1a9   : > { %p978_p11 = por %p977_p8, %p976_p5 }
 0x1ab   : > { %p979_p0 = pnand %p978_p11, %p972_p12 }
 0x1ad   : > { %982 = shalt.err (!%p979_p0)
}
 0x1ae   : > { %817 = dma.vmem_to_hbm [thread:$0]  (%p1432_p9), %s1362_s14, 256, %s1360_s25, %s626_s18  }
 0x1af PF: > { %s654_s10 = sand.u32 1, %s1017_s15   ;;  %p1433_p7 = scmp.ne.s32.totalorder %s1418_s30, 0 }
 0x1b0   : > { %p1434_p13 = scmp.ge.s32.totalorder %s1037_s20, 2  ;;  %s655_s12 = scalar_lea.sflag [#allocation5], %s654_s10 }
 0x1b2   : > { %p824_p3 = pnand %p1434_p13, %p1433_p7 }
 0x1b4   : > { %1012 = dma.done.wait (!%p824_p3), %s655_s12, 256  }
 0x1b5   : > { %1014 = vsyncadd (!%p824_p3), %s655_s12, 4294967040  ;;  %s20_s20 = sadd.s32 1, %s1037_s20   ;;  %s1435_s15 = smov %s1021_s16 }
 0x1b6   : > { %p17_p6 = scmp.ge.s32.totalorder %s20_s20, 4   ;;  %s1436_s16 = smov %s1025_s17 }
 0x1b7   : > { %s1437_s17 = smov %s1133_s29  ;;  %s1438_s18 = smov %s1033_s19 }
 0x1b8   : > { %s1439_s19 = smov %s1441_s23  ;;  %19 = sbr.rel (!%p17_p6) target bundleno = 6 (0x6), region = 91 }
 0x1bf   :  { %660 = vsyncpa [#allocation4], 1 }
 0x1c0   :  { %662 = vsyncpa [#allocation4 + $0x1], 1 }
 0x1c1   :  { %663 = vsyncpa [#allocation5], 1 }
 0x1c2   :  { %665 = vsyncpa [#allocation5 + $0x1], 1 }

</bundles_post_ra>
